<compile_context>
chip_gen: v7x
topology: tpu7x:2x2x1
jax: 0.10.0
libtpu: 0.0.40
codegen_flags: <defaults>
</compile_context>

<pallas_src>
import functools
import math

import jax
import jax.numpy as jnp
from jax import lax
from jax.experimental import pallas as pl
from jax.experimental.pallas import tpu as pltpu


LANE = 128
SUB = 8


def _round_up(x, m):
    return ((x + m - 1) // m) * m


def _cdiv(a, b):
    return -(-a // b)


def _pad_to(x, shape):
    pads = [(0, s - d) for d, s in zip(x.shape, shape)]
    if all(p == (0, 0) for p in pads):
        return x
    return jnp.pad(x, pads)


def _vmem_limit():
    # Generation-aware VMEM limit: leave ~16 MiB headroom (v7x has only 64 MiB
    # physical); cap at 96 MiB on the 128 MiB parts.  Safe fallback: 32 MiB.
    try:
        cap = getattr(pltpu.get_tpu_info(), "vmem_capacity_bytes", None)
        if cap:
            return int(min(cap - 16 * 1024 * 1024, 96 * 1024 * 1024))
    except Exception:
        pass
    return 32 * 1024 * 1024


VMEM_LIMIT = _vmem_limit()


def _cparams(semantics):
    return pltpu.CompilerParams(dimension_semantics=semantics,
                                vmem_limit_bytes=VMEM_LIMIT)


def _lane_tile(s_pad, max_tile=2048):
    """Lane-dim tile for the spatial axis: single tile if small, else >=2 tiles."""
    if s_pad <= 256:
        return s_pad
    nt = max(2, _cdiv(s_pad, max_tile))
    return _round_up(_cdiv(s_pad, nt), LANE)


def _row_tile(m_pad, max_tile=512):
    if m_pad <= max_tile:
        return m_pad
    nt = _cdiv(m_pad, max_tile)
    return _round_up(_cdiv(m_pad, nt), SUB)


# ----------------------------------------------------------------------------
# Pallas kernel bodies
# ----------------------------------------------------------------------------

def _apply_act(y, act, slope):
    if act == 'leaky':
        return jnp.where(y >= 0, y, y * slope)
    if act == 'relu':
        return jnp.maximum(y, 0.0)
    if act == 'sigmoid':
        # exact sigmoid (final RGB output parity); exp runs on the EUP slot anyway.
        return 1.0 / (1.0 + jnp.exp(-y))
    return y


def _mm_kernel(a_ref, b_ref, *rest, act, slope, has_bias):
    """Row-orientation (TM,K)@(K,N)+bias -> act (used for tiny row-major matmuls)."""
    if has_bias:
        bias_ref, o_ref = rest
    else:
        (o_ref,) = rest
    acc = jnp.dot(a_ref[...], b_ref[...], preferred_element_type=jnp.float32)
    if has_bias:
        acc = acc + bias_ref[...]
    o_ref[...] = _apply_act(acc, act, slope).astype(o_ref.dtype)


def _convT_kernel(w_ref, x_ref, *rest, act, slope, has_bias):
    """Flipped conv: (Cout,K) @ (K, S_tile) + bias -> act."""
    if has_bias:
        b_ref, o_ref = rest
    else:
        (o_ref,) = rest
    y = jnp.dot(w_ref[...], x_ref[...], preferred_element_type=jnp.float32)
    if has_bias:
        y = y + b_ref[...]                     # (Cout,1) broadcast over spatial lanes
    o_ref[...] = _apply_act(y, act, slope).astype(o_ref.dtype)


def _conv_in_T_kernel(w_ref, x_ref, o_ref, *, act, slope, eps, n_spatial):
    """Flipped conv fused with InstanceNorm2d(affine=False) + act (per-sample grid step).
    One-pass stats: padded spatial lanes are exact zeros (zero-padded patches, no bias),
    so dividing the raw sums by the true spatial count gives exact statistics."""
    y = jnp.dot(w_ref[...], x_ref[...], preferred_element_type=jnp.float32)
    inv_n = 1.0 / n_spatial
    s1 = jnp.sum(y, axis=1, keepdims=True)
    s2 = jnp.sum(y * y, axis=1, keepdims=True)
    mean = s1 * inv_n
    var = jnp.maximum(s2 * inv_n - mean * mean, 0.0)   # biased, like InstanceNorm2d
    y = (y - mean) * lax.rsqrt(var + eps)
    o_ref[...] = _apply_act(y, act, slope).astype(o_ref.dtype)


def _convmod_T_kernel(wb_ref, sc_ref, x_ref, o_ref, *, slope, eps, demod):
    """Conv2DMod fused: per-batch weight modulation + demodulation + conv + leaky.
    wb: base weight (Cout,K) f32, sc: per-K scale (1,K) f32, x: patches (K,S) bf16."""
    wmod = wb_ref[...] * sc_ref[...]
    if demod:
        d = lax.rsqrt(jnp.sum(wmod * wmod, axis=1, keepdims=True) + eps)
        wmod = wmod * d
    wm = wmod.astype(jnp.bfloat16)
    y = jnp.dot(wm, x_ref[...], preferred_element_type=jnp.float32)
    y = jnp.where(y >= 0, y, y * slope)
    o_ref[...] = y.astype(o_ref.dtype)


def _mlp2_kernel(x_ref, w1_ref, b1_ref, w2_ref, b2_ref, o_ref, *, slope):
    """Fused 2-layer MLP: (x @ w1 + b1) -> leaky -> (@ w2 + b2); hidden stays in VMEM."""
    h = jnp.dot(x_ref[...], w1_ref[...], preferred_element_type=jnp.float32)
    h = h + b1_ref[...]
    h = jnp.where(h >= 0, h, h * slope)
    y = jnp.dot(h.astype(w2_ref.dtype), w2_ref[...],
                preferred_element_type=jnp.float32)
    o_ref[...] = (y + b2_ref[...]).astype(o_ref.dtype)


def _fc_rownorm_kernel(x_ref, w_ref, b_ref, o_ref, *, n_feat):
    """Encoder fc + per-row (z - mean) / var fused.  Padded feature lanes are exact
    zeros (zero-padded weights / bias), so sums use the true feature count."""
    y = jnp.dot(x_ref[...], w_ref[...], preferred_element_type=jnp.float32)
    y = y + b_ref[...]
    lane = lax.broadcasted_iota(jnp.int32, y.shape, 1)
    mask = (lane < int(n_feat)).astype(jnp.float32)
    mean = jnp.sum(y, axis=1, keepdims=True) / n_feat
    d = (y - mean) * mask
    var = jnp.sum(d * d, axis=1, keepdims=True) / (n_feat - 1.0)   # unbiased torch.var
    # Divides by var (not std), no eps — matches the reference implementation.
    o_ref[...] = (y - mean) / var


# ----------------------------------------------------------------------------
# Pallas wrappers
# ----------------------------------------------------------------------------

def matmul(a, b, bias=None, act='none', slope=0.01, out_dtype=jnp.float32):
    """Row-orientation tiled (a @ b + bias) + act.  a:(M,K), b:(K,N)."""
    M, K = a.shape
    N = b.shape[1]
    Kp = _round_up(K, 16)
    Np = _round_up(N, LANE)
    Mp0 = _round_up(M, SUB)
    TM = _row_tile(Mp0)
    nt = _cdiv(Mp0, TM)
    Mp = TM * nt
    a_p = _pad_to(a.astype(jnp.bfloat16), (Mp, Kp))
    b_p = _pad_to(b.astype(jnp.bfloat16), (Kp, Np))
    in_specs = [pl.BlockSpec((TM, Kp), lambda i: (i, 0)),
                pl.BlockSpec((Kp, Np), lambda i: (0, 0))]
    args = [a_p, b_p]
    has_bias = bias is not None
    if has_bias:
        bias_p = _pad_to(jnp.asarray(bias).reshape(1, N).astype(jnp.float32), (1, Np))
        in_specs.append(pl.BlockSpec((1, Np), lambda i: (0, 0)))
        args.append(bias_p)
    kern = functools.partial(_mm_kernel, act=act, slope=slope, has_bias=has_bias)
    out = pl.pallas_call(
        kern,
        out_shape=jax.ShapeDtypeStruct((Mp, Np), out_dtype),
        grid=(nt,),
        in_specs=in_specs,
        out_specs=pl.BlockSpec((TM, Np), lambda i: (i, 0)),
        compiler_params=_cparams(("parallel",)),
    )(*args)
    return out[:M, :N]


def fused_mlp2(x, w1, b1, w2, b2, slope=0.01, out_dtype=jnp.float32):
    """Fused Linear -> LeakyReLU -> Linear, tiled over rows."""
    M, K1 = x.shape
    H = w1.shape[1]
    N = w2.shape[1]
    K1p = _round_up(K1, 16)
    Hp = _round_up(H, LANE)
    Np = _round_up(N, LANE)
    Mp0 = _round_up(M, SUB)
    TM = _row_tile(Mp0)
    nt = _cdiv(Mp0, TM)
    Mp = TM * nt
    x_p = _pad_to(x.astype(jnp.bfloat16), (Mp, K1p))
    w1_p = _pad_to(w1.astype(jnp.bfloat16), (K1p, Hp))
    b1_p = _pad_to(jnp.asarray(b1).reshape(1, -1).astype(jnp.float32), (1, Hp))
    w2_p = _pad_to(w2.astype(jnp.bfloat16), (Hp, Np))
    b2_p = _pad_to(jnp.asarray(b2).reshape(1, -1).astype(jnp.float32), (1, Np))
    out = pl.pallas_call(
        functools.partial(_mlp2_kernel, slope=slope),
        out_shape=jax.ShapeDtypeStruct((Mp, Np), out_dtype),
        grid=(nt,),
        in_specs=[pl.BlockSpec((TM, K1p), lambda i: (i, 0)),
                  pl.BlockSpec((K1p, Hp), lambda i: (0, 0)),
                  pl.BlockSpec((1, Hp), lambda i: (0, 0)),
                  pl.BlockSpec((Hp, Np), lambda i: (0, 0)),
                  pl.BlockSpec((1, Np), lambda i: (0, 0))],
        out_specs=pl.BlockSpec((TM, Np), lambda i: (i, 0)),
        compiler_params=_cparams(("parallel",)),
    )(x_p, w1_p, b1_p, w2_p, b2_p)
    return out[:M, :N]


def fc_rownorm(x, w, b):
    """Encoder tail: fc matmul fused with (z - mean) / var (matches the reference)."""
    M, K = x.shape
    N = w.shape[1]
    Kp = _round_up(K, 16)
    Np = _round_up(N, LANE)
    Mp = _round_up(M, SUB)
    x_p = _pad_to(x.astype(jnp.bfloat16), (Mp, Kp))
    w_p = _pad_to(w.astype(jnp.bfloat16), (Kp, Np))
    b_p = _pad_to(jnp.asarray(b).reshape(1, N).astype(jnp.float32), (1, Np))
    out = pl.pallas_call(
        functools.partial(_fc_rownorm_kernel, n_feat=float(N)),
        out_shape=jax.ShapeDtypeStruct((Mp, Np), jnp.float32),
        grid=(1,),
        in_specs=[pl.BlockSpec((Mp, Kp), lambda i: (0, 0)),
                  pl.BlockSpec((Kp, Np), lambda i: (0, 0)),
                  pl.BlockSpec((1, Np), lambda i: (0, 0))],
        out_specs=pl.BlockSpec((Mp, Np), lambda i: (0, 0)),
        compiler_params=_cparams(("arbitrary",)),
    )(x_p, w_p, b_p)
    return out[:M, :N]


# ----------------------------------------------------------------------------
# Convolutions (flipped orientation: spatial on lanes)
# ----------------------------------------------------------------------------

def im2col_T(x, k, stride, padding):
    """Patches in (B, Cin*k*k, Ho*Wo) layout (K on sublanes, spatial on lanes),
    K ordered channel-major (c, kk).  Cast to bf16 before any padding.
    TODO(synk): im2col is still materialized in HBM; an in-kernel haloed-tile
    variant would remove the k*k blowup for the 3x3 convs."""
    x = x.astype(jnp.bfloat16)
    B, C, H, W = x.shape
    xp = jnp.pad(x, ((0, 0), (0, 0), (padding, padding), (padding, padding)))
    Ho = (H + 2 * padding - k) // stride + 1
    Wo = (W + 2 * padding - k) // stride + 1
    cols = []
    for i in range(k):
        for j in range(k):
            cols.append(xp[:, :, i:i + stride * Ho:stride, j:j + stride * Wo:stride])
    patches = jnp.stack(cols, axis=2)                  # (B, C, k*k, Ho, Wo)
    return patches.reshape(B, C * k * k, Ho * Wo), Ho, Wo


def conv2d(x, w, b=None, stride=1, padding=0, act='none', slope=0.01,
           out_dtype=jnp.bfloat16):
    """Shared-weight conv: W(Cout,K) @ patches(K,S); grid over (batch, spatial tiles)."""
    B, Cin, H, W = x.shape
    Cout, _, k, _ = w.shape
    patches, Ho, Wo = im2col_T(x, k, stride, padding)
    K, S = Cin * k * k, Ho * Wo
    Kp = _round_up(K, 16)
    Op = _round_up(Cout, SUB)
    S_pad = _round_up(S, LANE)
    TN = _lane_tile(S_pad)
    nt = _cdiv(S_pad, TN)
    Sp = TN * nt
    patches_p = _pad_to(patches, (B, Kp, Sp))
    w_p = _pad_to(w.reshape(Cout, K).astype(jnp.bfloat16), (Op, Kp))
    in_specs = [pl.BlockSpec((Op, Kp), lambda bb, j: (0, 0)),
                pl.BlockSpec((None, Kp, TN), lambda bb, j: (bb, 0, j))]
    args = [w_p, patches_p]
    has_bias = b is not None
    if has_bias:
        b_p = _pad_to(jnp.asarray(b).reshape(Cout, 1).astype(jnp.float32), (Op, 1))
        in_specs.append(pl.BlockSpec((Op, 1), lambda bb, j: (0, 0)))
        args.append(b_p)
    kern = functools.partial(_convT_kernel, act=act, slope=slope, has_bias=has_bias)
    y = pl.pallas_call(
        kern,
        out_shape=jax.ShapeDtypeStruct((B, Op, Sp), out_dtype),
        grid=(B, nt),
        in_specs=in_specs,
        out_specs=pl.BlockSpec((None, Op, TN), lambda bb, j: (bb, 0, j)),
        compiler_params=_cparams(("parallel", "parallel")),
    )(*args)
    return y[:, :Cout, :S].reshape(B, Cout, Ho, Wo)


def conv2d_in_act(x, w, stride=1, padding=1, act='relu', slope=0.01, eps=1e-5,
                  out_dtype=jnp.bfloat16):
    """Conv2d + InstanceNorm2d(affine=False) + act fused (per-batch grid step).
    The conv bias is dropped: InstanceNorm cancels it exactly.
    The per-sample working set is only Cout x S (spatial on lanes).
    TODO(synk): for very large resolutions a two-pass tiled spatial reduction
    would be needed to stay inside v7x's 64 MiB VMEM."""
    B, Cin, H, W = x.shape
    Cout, _, k, _ = w.shape
    patches, Ho, Wo = im2col_T(x, k, stride, padding)
    K, S = Cin * k * k, Ho * Wo
    Kp = _round_up(K, 16)
    Op = _round_up(Cout, SUB)
    Sp = _round_up(S, LANE)
    patches_p = _pad_to(patches, (B, Kp, Sp))
    w_p = _pad_to(w.reshape(Cout, K).astype(jnp.bfloat16), (Op, Kp))
    kern = functools.partial(_conv_in_T_kernel, act=act, slope=slope, eps=eps,
                             n_spatial=float(S))
    y = pl.pallas_call(
        kern,
        out_shape=jax.ShapeDtypeStruct((B, Op, Sp), out_dtype),
        grid=(B,),
        in_specs=[pl.BlockSpec((Op, Kp), lambda bb: (0, 0)),
                  pl.BlockSpec((None, Kp, Sp), lambda bb: (bb, 0, 0))],
        out_specs=pl.BlockSpec((None, Op, Sp), lambda bb: (bb, 0, 0)),
        compiler_params=_cparams(("parallel",)),
    )(w_p, patches_p)
    return y[:, :Cout, :S].reshape(B, Cout, Ho, Wo)


def conv2d_mod(x, weight, style_w, style_b, style, demod=True, eps=1e-8, slope=0.2,
               out_dtype=jnp.bfloat16):
    """Conv2DMod + LeakyReLU: weight modulation/demodulation fused into the conv
    kernel prologue.  The style Linear is tiny (B x latent @ latent x Cin) and is
    folded into the per-K scale in plain jnp (no pallas_call launch for it)."""
    B, Cin, H, W = x.shape
    O, _, k, _ = weight.shape
    s = style.astype(jnp.float32) @ style_w + jnp.asarray(style_b).reshape(1, -1)
    scale = jnp.repeat(s + 1.0, k * k, axis=1)          # (B, Cin*k*k), (c, kk) order
    patches, Ho, Wo = im2col_T(x, k, 1, (k - 1) // 2)
    K, S = Cin * k * k, Ho * Wo
    Kp = _round_up(K, 16)
    Op = _round_up(O, SUB)
    Sp = _round_up(S, LANE)
    patches_p = _pad_to(patches, (B, Kp, Sp))
    wb_p = _pad_to(weight.reshape(O, K).astype(jnp.float32), (Op, Kp))
    sc_p = _pad_to(scale.astype(jnp.float32), (B, Kp)).reshape(B, 1, Kp)
    y = pl.pallas_call(
        functools.partial(_convmod_T_kernel, slope=slope, eps=eps, demod=demod),
        out_shape=jax.ShapeDtypeStruct((B, Op, Sp), out_dtype),
        grid=(B,),
        in_specs=[pl.BlockSpec((Op, Kp), lambda bb: (0, 0)),
                  pl.BlockSpec((None, 1, Kp), lambda bb: (bb, 0, 0)),
                  pl.BlockSpec((None, Kp, Sp), lambda bb: (bb, 0, 0))],
        out_specs=pl.BlockSpec((None, Op, Sp), lambda bb: (bb, 0, 0)),
        compiler_params=_cparams(("parallel",)),
    )(wb_p, sc_p, patches_p)
    return y[:, :O, :S].reshape(B, O, Ho, Wo)


# ----------------------------------------------------------------------------
# Upsample / pooling / grid_sample glue
# ----------------------------------------------------------------------------

def _interp_matrix(out_n, in_n, align_corners):
    d = jnp.arange(out_n, dtype=jnp.float32)
    if align_corners:
        src = d * ((in_n - 1) / (out_n - 1)) if out_n > 1 else jnp.zeros_like(d)
    else:
        src = jnp.maximum((d + 0.5) * (in_n / out_n) - 0.5, 0.0)
    i0 = jnp.clip(jnp.floor(src).astype(jnp.int32), 0, in_n - 1)
    i1 = jnp.minimum(i0 + 1, in_n - 1)
    w1 = src - i0.astype(jnp.float32)
    rows = jnp.arange(out_n)
    A = jnp.zeros((out_n, in_n), jnp.float32)
    A = A.at[rows, i0].add(1.0 - w1)
    A = A.at[rows, i1].add(w1)
    return A


def upsample_bilinear_x2(x, align_corners):
    """Gather-free separable bilinear x2: two constant-matrix contractions."""
    B, C, H, W = x.shape
    Ah = _interp_matrix(2 * H, H, align_corners)
    Aw = _interp_matrix(2 * W, W, align_corners)
    xf = x.astype(jnp.float32)
    y = jnp.einsum('oh,bchw->bcow', Ah, xf)
    y = jnp.einsum('bcow,pw->bcop', y, Aw)
    return y.astype(x.dtype)


def maxpool2(x):
    B, C, H, W = x.shape
    return x.reshape(B, C, H // 2, 2, W // 2, 2).max(axis=(3, 5))


def grid_sample_bilinear(plane, grid):
    """F.grid_sample(mode='bilinear', align_corners=True, padding_mode='zeros').
    plane: (B,C,Hp,Wp); grid: (B,N,T,2) with (x, y).  Returns (B,C,N,T).
    TODO(synk): data-dependent gather kept in plain JAX glue."""
    B, C, Hp, Wp = plane.shape
    gx, gy = grid[..., 0], grid[..., 1]
    ix = (gx + 1.0) * 0.5 * (Wp - 1)
    iy = (gy + 1.0) * 0.5 * (Hp - 1)
    ix0, iy0 = jnp.floor(ix), jnp.floor(iy)
    ix1, iy1 = ix0 + 1, iy0 + 1
    wx1, wy1 = ix - ix0, iy - iy0
    wx0, wy0 = 1.0 - wx1, 1.0 - wy1
    flat = plane.astype(jnp.float32).reshape(B, C, Hp * Wp)

    def gather(ixx, iyy):
        inb = (ixx >= 0) & (ixx <= Wp - 1) & (iyy >= 0) & (iyy <= Hp - 1)
        ixc = jnp.clip(ixx, 0, Wp - 1).astype(jnp.int32)
        iyc = jnp.clip(iyy, 0, Hp - 1).astype(jnp.int32)
        idx = iyc * Wp + ixc
        vals = jnp.take_along_axis(flat, idx.reshape(B, 1, -1), axis=2)
        vals = vals.reshape(B, C, *idx.shape[1:])
        return vals * inb[:, None].astype(jnp.float32)

    v00, v01 = gather(ix0, iy0), gather(ix1, iy0)
    v10, v11 = gather(ix0, iy1), gather(ix1, iy1)
    out = (v00 * (wx0 * wy0)[:, None] + v01 * (wx1 * wy0)[:, None]
           + v10 * (wx0 * wy1)[:, None] + v11 * (wx1 * wy1)[:, None])
    return out


def embed_fn(x, num_freqs):
    """Embedder: cat([x, sin(f*x), cos(f*x) for f in 2**range(nf)], -1)."""
    outs = [x]
    for i in range(num_freqs):
        f = 2.0 ** i
        outs.append(jnp.sin(x * f))
        outs.append(jnp.cos(x * f))
    return jnp.concatenate(outs, axis=-1)


# ----------------------------------------------------------------------------
# Parameter initialization (deterministic, synthetic)
# ----------------------------------------------------------------------------

class Rng:
    def __init__(self, seed):
        self.key = jax.random.PRNGKey(seed)

    def next(self):
        self.key, sub = jax.random.split(self.key)
        return sub


def linear_params(rng, din, dout):
    w = jax.random.normal(rng.next(), (din, dout), jnp.float32) / math.sqrt(din)
    b = 0.01 * jax.random.normal(rng.next(), (1, dout), jnp.float32)
    return {'w': w, 'b': b}


def conv_params(rng, cin, cout, k, bias=True):
    w = jax.random.normal(rng.next(), (cout, cin, k, k), jnp.float32) / math.sqrt(cin * k * k)
    p = {'w': w}
    if bias:
        p['b'] = 0.01 * jax.random.normal(rng.next(), (1, cout), jnp.float32)
    return p


def mlp_init(rng, dims):
    assert len(dims) < 5, "skip-MLP variant not used by this config"
    return [linear_params(rng, dims[i], dims[i + 1]) for i in range(len(dims) - 1)]


def mlp_apply(params, x):
    if len(params) == 2:
        return fused_mlp2(x, params[0]['w'], params[0]['b'],
                          params[1]['w'], params[1]['b'], slope=0.01)
    n = len(params)
    for i, p in enumerate(params):
        act = 'leaky' if i < n - 1 else 'none'
        x = matmul(x, p['w'], bias=p['b'], act=act, slope=0.01)
    return x


# ----- Encoder --------------------------------------------------------------

def encoder_init(rng, latent_dim, dims):
    convs = [conv_params(rng, dims[i], dims[i + 1], 3, bias=True) for i in range(len(dims) - 1)]
    fc = linear_params(rng, dims[-1] * 8 * 8, latent_dim)
    return {'convs': convs, 'fc': fc}


def encoder_apply(params, x):
    for p in params['convs']:
        # Conv2d(stride=2,pad=1) + InstanceNorm2d + LeakyReLU fused; the conv bias
        # is dropped (InstanceNorm(affine=False) cancels it exactly).
        x = conv2d_in_act(x, p['w'], stride=2, padding=1, act='leaky', slope=0.01)
    B = x.shape[0]
    z = x.reshape(B, -1)
    # fc matmul + (z - mean) / var fused in one kernel.
    return fc_rownorm(z, params['fc']['w'], params['fc']['b'])


# ----- StyleGAN-like Generator ----------------------------------------------

def generator_init(rng, image_size, latent_dim, network_capacity, fmap_max=256):
    num_layers = int(math.log2(image_size) - 1)
    filters = [network_capacity * 2 ** (i + 1) for i in range(num_layers)][::-1]
    filters = [min(f, fmap_max) for f in filters]
    init_channels = filters[0]
    filters = [init_channels, *filters]
    params = {
        'to_initial': 0.05 * jax.random.normal(rng.next(), (latent_dim, init_channels, 4, 4), jnp.float32),
        'initial_conv': conv_params(rng, filters[0], filters[0], 3, bias=True),
        'blocks': [],
    }
    for ind, (cin, cout) in enumerate(zip(filters[:-1], filters[1:])):
        params['blocks'].append({
            'upsample': ind != 0,
            'to_style1': linear_params(rng, latent_dim, cin),
            'conv1_w': jax.random.normal(rng.next(), (cout, cin, 3, 3), jnp.float32) / math.sqrt(cin * 9),
            'to_style2': linear_params(rng, latent_dim, cout),
            'conv2_w': jax.random.normal(rng.next(), (cout, cout, 3, 3), jnp.float32) / math.sqrt(cout * 9),
        })
    return params


def generator_apply(params, style):
    B, L = style.shape
    init_ch = params['to_initial'].shape[1]
    # ConvTranspose2d(latent,init,4,1,0,bias=False) on a 1x1 input == matmul with weight
    x = matmul(style, params['to_initial'].reshape(L, init_ch * 16), out_dtype=jnp.bfloat16)
    x = x.reshape(B, init_ch, 4, 4)
    x = conv2d(x, params['initial_conv']['w'], b=params['initial_conv']['b'],
               stride=1, padding=1)
    for blk in params['blocks']:
        if blk['upsample']:
            x = upsample_bilinear_x2(x, align_corners=False)
        x = conv2d_mod(x, blk['conv1_w'], blk['to_style1']['w'], blk['to_style1']['b'],
                       style, slope=0.2)
        x = conv2d_mod(x, blk['conv2_w'], blk['to_style2']['w'], blk['to_style2']['b'],
                       style, slope=0.2)
    return x


# ----- HeadModule ------------------------------------------------------------

def headmodule_init(rng, hopt):
    return {
        'generator': generator_init(rng, hopt['triplane_res'], hopt['exp_dim_3d'],
                                    hopt['triplane_dim'] * 3 // 2),
        'density_mlp': mlp_init(rng, hopt['density_mlp']),
        'color_mlp': mlp_init(rng, hopt['color_mlp']),
    }


def headmodule_apply(params, hopt, data):
    query_pts = data['query_pts']              # (B, 3, N)
    query_viewdirs = data['query_viewdirs']    # (B, 3, N)
    B, C, N = query_pts.shape
    # TODO(synk): 'pose'/'scale' branch uses so3_exponential_map which is undefined in the
    #             reference source; eval path without 'pose' is reproduced here.
    qv = jnp.transpose(query_viewdirs, (0, 2, 1)).reshape(B * N, C)
    qv_emb = embed_fn(qv, hopt['view_freq'])

    tri = generator_apply(params['generator'], data['exp_code_3d'])
    plane_dim = tri.shape[1] // 3
    plane_x = tri[:, 0 * plane_dim:1 * plane_dim]
    plane_y = tri[:, 1 * plane_dim:2 * plane_dim]
    plane_z = tri[:, 2 * plane_dim:3 * plane_dim]

    bbox = hopt['bbox']
    u = (query_pts[:, 0:1] - 0.5 * (bbox[0][0] + bbox[0][1])) / (0.5 * (bbox[0][1] - bbox[0][0]))
    v = (query_pts[:, 1:2] - 0.5 * (bbox[1][0] + bbox[1][1])) / (0.5 * (bbox[1][1] - bbox[1][0]))
    w = (query_pts[:, 2:3] - 0.5 * (bbox[2][0] + bbox[2][1])) / (0.5 * (bbox[2][1] - bbox[2][0]))

    def to_grid(a, b):   # cat along channel, rearrange 'b (t c) n -> b n t c', t=1
        g = jnp.concatenate([a, b], axis=1)                 # (B, 2, N)
        return jnp.transpose(g, (0, 2, 1))[:, :, None, :]   # (B, N, 1, 2)

    fx = grid_sample_bilinear(plane_x, to_grid(v, w))
    fy = grid_sample_bilinear(plane_y, to_grid(u, w))
    fz = grid_sample_bilinear(plane_z, to_grid(u, v))
    feature = (fx + fy + fz).reshape(B, plane_dim, N)

    feat2 = jnp.transpose(feature, (0, 2, 1)).reshape(B * N, plane_dim)
    density = mlp_apply(params['density_mlp'], feat2)
    density = density.reshape(B, N, -1).transpose(0, 2, 1)
    # TODO(synk): training-time density noise (torch.randn_like * noise) skipped (eval mode).
    color_in = jnp.concatenate([feat2, qv_emb], axis=1)
    color = mlp_apply(params['color_mlp'], color_in)
    color = color.reshape(B, N, -1).transpose(0, 2, 1)

    out = dict(data)
    out['density'] = density
    out['color'] = color
    return out


# ----- Upsampler (small U-Net) -----------------------------------------------

def double_conv_init(rng, cin, cout, mid=None):
    mid = mid if mid else cout
    return {'c1': conv_params(rng, cin, mid, 3, bias=False),
            'c2': conv_params(rng, mid, cout, 3, bias=False)}


def double_conv_apply(p, x):
    # Conv2d(bias=False) + InstanceNorm2d + ReLU fused, twice.
    # TODO(synk): fusing both convs into one kernel needs a haloed second conv;
    #             kept as two fused conv+IN+ReLU kernels.
    x = conv2d_in_act(x, p['c1']['w'], stride=1, padding=1, act='relu')
    x = conv2d_in_act(x, p['c2']['w'], stride=1, padding=1, act='relu')
    return x


def upsampler_init(rng, input_dim, output_dim, capacity):
    dims = [capacity * s for s in [4, 8, 4, 2, 1]]
    return {
        'inc': double_conv_init(rng, input_dim, dims[0]),
        'down1': double_conv_init(rng, dims[0], dims[1]),
        'up1': double_conv_init(rng, dims[0] + dims[1], dims[2], (dims[0] + dims[1]) // 2),
        'up2': double_conv_init(rng, dims[2], dims[3], dims[2] // 2),
        'up3': double_conv_init(rng, dims[3], dims[4], dims[3] // 2),
        'outc': conv_params(rng, dims[4], output_dim, 1, bias=True),
    }


def up_apply(p, x1, x2=None):
    x1 = upsample_bilinear_x2(x1, align_corners=True)
    if x2 is not None:
        dH = x2.shape[2] - x1.shape[2]
        dW = x2.shape[3] - x1.shape[3]
        x1 = jnp.pad(x1, ((0, 0), (0, 0), (dH // 2, dH - dH // 2), (dW // 2, dW - dW // 2)))
        x = jnp.concatenate([x2, x1.astype(x2.dtype)], axis=1)
    else:
        x = x1
    return double_conv_apply(p, x)


def upsampler_apply(p, x):
    x1 = double_conv_apply(p['inc'], x)
    x2 = double_conv_apply(p['down1'], maxpool2(x1))
    y = up_apply(p['up1'], x2, x1)
    y = up_apply(p['up2'], y)
    y = up_apply(p['up3'], y)
    y = conv2d(y, p['outc']['w'], b=p['outc']['b'], stride=1, padding=0,
               act='sigmoid', out_dtype=jnp.float32)
    return y


# ----------------------------------------------------------------------------
# AvatarModule
# ----------------------------------------------------------------------------

def avatar_init(rng, opt):
    return {
        'encoder': encoder_init(rng, opt['exp_dim_2d'], opt['encoder_dims']),
        'mapping_mlp': mlp_init(rng, opt['mapping_dims']),
        'headmodule': headmodule_init(rng, opt['headmodule']),
        'upsampler': upsampler_init(rng, opt['headmodule']['color_mlp'][-1], 3,
                                    opt['upsampler_capacity']),
    }


def avatar_forward(params, opt, func, data):
    if func == 'encode':
        return encoder_apply(params['encoder'], data - 0.5)
    elif func == 'mapping':
        return mlp_apply(params['mapping_mlp'], data)
    elif func == 'head':
        return headmodule_apply(params['headmodule'], opt['headmodule'], data)
    elif func == 'upsample':
        return upsampler_apply(params['upsampler'], data)


# ----------------------------------------------------------------------------
# Main
# ----------------------------------------------------------------------------

if __name__ == "__main__":
    view_freq = 2
    opt = {
        'exp_dim_2d': 16,
        'encoder_dims': [3, 8, 16],
        'mapping_dims': [16, 32, 16],
        'upsampler_capacity': 8,
        'headmodule': {
            'triplane_res': 8,
            'exp_dim_3d': 16,
            'triplane_dim': 8,
            'density_mlp': [8, 32, 1],
            'color_mlp': [8 + 3 * (1 + 2 * view_freq), 32, 8],
            'pos_freq': 4,
            'view_freq': view_freq,
            'noise': 0.0,
            'bbox': [[-1.0, 1.0], [-1.0, 1.0], [-1.0, 1.0]],
        },
    }

    rng = Rng(0)
    params = avatar_init(rng, opt)

    key = jax.random.PRNGKey(0)
    k1, k2, k3, k4 = jax.random.split(key, 4)
    B, N = 2, 8

    # encode: image in [0,1], 32x32 so that two stride-2 convs give the 8x8 the fc expects
    img = jax.random.uniform(k1, (B, 3, 32, 32), jnp.float32)
    exp2d = avatar_forward(params, opt, 'encode', img)

    # mapping: 2D exp code -> 3D exp code
    exp3d = avatar_forward(params, opt, 'mapping', exp2d)

    # head: query points / viewdirs + 3D exp code -> density & color
    pts = jax.random.uniform(k2, (B, 3, N), jnp.float32, minval=-0.9, maxval=0.9)
    dirs = jax.random.normal(k3, (B, 3, N), jnp.float32)
    dirs = dirs / jnp.linalg.norm(dirs, axis=1, keepdims=True)
    head_out = avatar_forward(params, opt, 'head',
                              {'query_pts': pts, 'query_viewdirs': dirs, 'exp_code_3d': exp3d})

    # upsample: neural feature map -> RGB
    feat_map = jax.random.uniform(k4, (1, opt['headmodule']['color_mlp'][-1], 16, 16), jnp.float32)
    rgb = avatar_forward(params, opt, 'upsample', feat_map)

    jax.block_until_ready((exp2d, exp3d, head_out['density'], head_out['color'], rgb))
    assert exp2d.shape == (B, 16)
    assert exp3d.shape == (B, 16)
    assert head_out['density'].shape == (B, 1, N)
    assert head_out['color'].shape == (B, 8, N)
    assert rgb.shape == (1, 3, 64, 64)
    print("KERNEL_OK")
</pallas_src>

<mosaic_0001>
module attributes {stable_mosaic.version = 11 : i64} {
  func.func @_conv_in_T_kernel(%arg0: i32, %arg1: memref<8x32xbf16, #tpu.memory_space<vmem>>, %arg2: memref<1x32x256xbf16, #tpu.memory_space<vmem>>, %arg3: memref<1x8x256xbf16, #tpu.memory_space<vmem>>) attributes {dimension_semantics = [#tpu.dimension_semantics<parallel>], iteration_bounds = array<i64: 2>, scalar_prefetch = 0 : i64, scratch_operands = 0 : i64, tpu.core_type = #tpu.core_type<tc>, window_params = [{pipeline_mode = #tpu.pipeline_mode<synchronous>, transform_indices = @transform_0, window_bounds = array<i64: 8, 32>}, {transform_indices = @transform_1, window_bounds = array<i64: 1, 32, 256>}, {transform_indices = @transform_2, window_bounds = array<i64: 1, 8, 256>}]} {
    %c0 = arith.constant 0 : index
    %c0_0 = arith.constant 0 : index
    %0 = vector.load %arg1[%c0, %c0_0] : memref<8x32xbf16, #tpu.memory_space<vmem>>, vector<8x32xbf16>
    %c0_1 = arith.constant 0 : index
    %c0_2 = arith.constant 0 : index
    %c0_3 = arith.constant 0 : index
    %1 = vector.load %arg2[%c0_1, %c0_2, %c0_3] : memref<1x32x256xbf16, #tpu.memory_space<vmem>>, vector<1x32x256xbf16>
    %2 = vector.shape_cast %1 : vector<1x32x256xbf16> to vector<32x256xbf16>
    %cst = arith.constant dense<0.000000e+00> : vector<8x256xf32>
    %3 = tpu.matmul %0, %2, %cst {dimension_numbers = #tpu.dot_dimension_numbers<[1], [0], [0], [1], [0, 0, 1, 1], [], []>} : vector<8x32xbf16>, vector<32x256xbf16>, vector<8x256xf32> -> vector<8x256xf32>
    %cst_4 = arith.constant dense<0.000000e+00> : vector<8xf32>
    %4 = vector.multi_reduction <add>, %3, %cst_4 [1] : vector<8x256xf32> to vector<8xf32>
    %5 = vector.shape_cast %4 : vector<8xf32> to vector<8x1xf32>
    %6 = arith.mulf %3, %3 : vector<8x256xf32>
    %cst_5 = arith.constant dense<0.000000e+00> : vector<8xf32>
    %7 = vector.multi_reduction <add>, %6, %cst_5 [1] : vector<8x256xf32> to vector<8xf32>
    %8 = vector.shape_cast %7 : vector<8xf32> to vector<8x1xf32>
    %cst_6 = arith.constant 3.906250e-03 : f32
    %9 = vector.broadcast %cst_6 : f32 to vector<8x1xf32>
    %10 = arith.mulf %5, %9 : vector<8x1xf32>
    %cst_7 = arith.constant 3.906250e-03 : f32
    %11 = vector.broadcast %cst_7 : f32 to vector<8x1xf32>
    %12 = arith.mulf %8, %11 : vector<8x1xf32>
    %13 = arith.mulf %10, %10 : vector<8x1xf32>
    %14 = arith.subf %12, %13 : vector<8x1xf32>
    %cst_8 = arith.constant 0.000000e+00 : f32
    %15 = vector.broadcast %cst_8 : f32 to vector<8x1xf32>
    %16 = arith.maximumf %14, %15 : vector<8x1xf32>
    %17 = vector.broadcast %10 : vector<8x1xf32> to vector<8x256xf32>
    %18 = arith.subf %3, %17 : vector<8x256xf32>
    %cst_9 = arith.constant 9.99999974E-6 : f32
    %19 = vector.broadcast %cst_9 : f32 to vector<8x1xf32>
    %20 = arith.addf %16, %19 : vector<8x1xf32>
    %21 = math.rsqrt %20 : vector<8x1xf32>
    %22 = vector.broadcast %21 : vector<8x1xf32> to vector<8x256xf32>
    %23 = arith.mulf %18, %22 : vector<8x256xf32>
    %cst_10 = arith.constant 0.000000e+00 : f32
    %24 = vector.broadcast %cst_10 : f32 to vector<8x256xf32>
    %25 = arith.cmpf oge, %23, %24 : vector<8x256xf32>
    %cst_11 = arith.constant 0.00999999977 : f32
    %26 = vector.broadcast %cst_11 : f32 to vector<8x256xf32>
    %27 = arith.mulf %23, %26 : vector<8x256xf32>
    %28 = arith.select %25, %23, %27 : vector<8x256xi1>, vector<8x256xf32>
    %29 = arith.truncf %28 : vector<8x256xf32> to vector<8x256xbf16>
    %c0_12 = arith.constant 0 : index
    %c0_13 = arith.constant 0 : index
    %c0_14 = arith.constant 0 : index
    %30 = vector.load %arg3[%c0_12, %c0_13, %c0_14] : memref<1x8x256xbf16, #tpu.memory_space<vmem>>, vector<1x8x256xbf16>
    %31 = vector.shape_cast %30 : vector<1x8x256xbf16> to vector<8x256xbf16>
    %32 = vector.shape_cast %29 : vector<8x256xbf16> to vector<1x8x256xbf16>
    tpu.vector_store %arg3[%c0_12, %c0_13, %c0_14], %32 {strides = array<i32>} : memref<1x8x256xbf16, #tpu.memory_space<vmem>>, vector<1x8x256xbf16>,
    return
  }
  func.func @transform_0(%arg0: i32) -> (i32, i32) {
    %c0_i32 = arith.constant 0 : i32
    %c0_i32_0 = arith.constant 0 : i32
    %c0_i32_1 = arith.constant 0 : i32
    return %c0_i32, %c0_i32_0 : i32, i32
  }
  func.func @transform_1(%arg0: i32) -> (i32, i32, i32) {
    %c0_i32 = arith.constant 0 : i32
    %c0_i32_0 = arith.constant 0 : i32
    %c0_i32_1 = arith.constant 0 : i32
    return %arg0, %c0_i32, %c0_i32_0 : i32, i32, i32
  }
  func.func @transform_2(%arg0: i32) -> (i32, i32, i32) {
    %c0_i32 = arith.constant 0 : i32
    %c0_i32_0 = arith.constant 0 : i32
    %c0_i32_1 = arith.constant 0 : i32
    return %arg0, %c0_i32, %c0_i32_0 : i32, i32, i32
  }
}

</mosaic_0001>

<bundles_post_ra>
// kernel: tpu_custom_call.1
= control target key start
LH: loop header
LB: loop body
LE: loop exit
PB: predicated region body
PF: predicated region fallthrough
CT: control target
= control target key end

     0   :  { %7 = vsyncpa [#allocation3], 0  ;;  %s818_s0 = inlined_call_operand.hbm [shape: bf16[8,32], index: 0, kind: input, shape index: {}]   ;;  %s819_s1 = inlined_call_operand.hbm [shape: bf16[2,32,256], index: 1, kind: input, shape index: {}]   ;;  %s820_s2 = inlined_call_operand.hbm [shape: bf16[2,8,256], index: 2, kind: output, shape index: {}]  }
   0x1   :  { %8 = vsyncpa [#allocation6], 0 }
   0x2   :  { %10 = vsyncpa [#allocation6 + $0x1], 0 }
   0x3   :  { %11 = vsyncpa [#allocation4], 0 }
   0x4   :  { %13 = vsyncpa [#allocation4 + $0x1], 0  ;;  %s621_s9 = smov 0   ;;  %s623_s10 = smov 0  }
   0x5   :  { %s625_s11 = smov 0   ;;  %s627_s12 = smov 0  }
   0x6 LB: > { %s642_s13 = sadd.s32 4294967295, %s598_s12   ;;  %s377_s14 = sadd.s32 4294967294, %s598_s12   ;;  %s598_s12 = sphi %s627_s12, %s845_s12   ;;  %s594_s11 = sphi %s625_s11, %s844_s11   ;;  %s590_s10 = sphi %s623_s10, %s843_s10   ;;  %s586_s9 = sphi %s621_s9, %s842_s9  }
   0x7   : > { %s646_s15 = sadd.s32 1, %s598_s12   ;;  %s47_s16 = sadd.s32 1, %s594_s11 }
   0x8   : > { %s44_s17 = ssub.s32 %s598_s12, %s646_s15  ;;  %p54_p0 = scmp.ne.s32.totalorder %s594_s11, %s590_s10 }
   0x9   : > { %p45_p1 = scmp.eq.s32.totalorder %s44_s17, 0  ;;  %p55_p2 = scmp.eq.s32.totalorder %s598_s12, 0 }
   0xa   : > { %p60_p3 = scmp.ne.s32.totalorder %s590_s10, %s586_s9  ;;  %p821_p4 = scmp.eq.s32.totalorder %s642_s13, 0 }
   0xb   : > { %s658_s18 = scalar_select %p45_p1, %s594_s11, %s47_s16  }
   0xc   : > { %p660_p5 = por %p55_p2, %p54_p0  ;;  %p666_p6 = por %p821_p4, %p60_p3 }
   0xd   : > { %p84_p7 = scmp.eq.s32.totalorder %s642_s13, 1  ;;  %p90_p8 = scmp.eq.s32.totalorder %s377_s14, 1 }
   0xe   : > { %s827_s20 = scalar_select %p666_p6, 1, 0 }
   0xf   : > { %p378_p9 = scmp.ge.s32.totalorder %s598_s12, 1  ;;  %p97_p10 = scmp.lt.s32.totalorder %s598_s12, 3 }
  0x10   : > { %p673_p11 = por %p84_p7, %p54_p0  ;;  %p677_p12 = por %p90_p8, %p60_p3 }
  0x11   : > { %p681_p13 = pnand %p378_p9, %p97_p10  ;;  %s600_s24 = smov [#allocation2]  }
  0x12   : > { %s828_s21 = scalar_select %p673_p11, 1, 0 }
  0x13   : > { %s829_s22 = scalar_select %p677_p12, 1, 0 }
  0x14   : > { %s830_s23 = scalar_select %p681_p13, 1, 0 }
  0x15   : > { %p410_p2 = pneg %p681_p13  ;;  %s110_s25 = sshll.u32 %s600_s24, 4  ;;  %s111_s25 = int_to_ptr.vmem [resolvable:$true] %s110_s25 }
  0x16   : > { %p423_p4 = scmp.lt.s32.totalorder %s598_s12, 2  ;;  %p831_p0 = scmp.eq.s32.totalorder %s642_s13, 0 }
  0x17   : > { %s121_s27 = sand.u32 1, %s594_s11   ;;  %s470_s4 = scalar_lea.hbm %s818_s0, 64 }
  0x18   : > { %p691_p7 = pnand %p410_p2, %p831_p0  ;;  %p698_p3 = pnand %p423_p4, %p660_p5 }
  0x19   : > { %s381_s29 = sshll.u32 %s121_s27, 5  ;;  %p471_p8 = scmp.ne.s32.totalorder %s818_s0, %s470_s4 }
  0x1a   : > { %s833_s28 = scalar_select %p698_p3, 1, 0 }
  0x1b   : > { %p472_p9 = pneg %p691_p7  ;;  %p477_p4 = scmp.lt.u32.totalorder %s470_s4, %s818_s0 }
  0x1d   : > { %p473_p10 = pnand %p472_p9, %p471_p8 }
  0x1f   : > { %p474_p2 = pneg %p473_p10 }
  0x21   : > { %p479_p5 = pnand %p477_p4, %p474_p2 }
  0x23   : > { %482 = shalt.err (!%p479_p5)
}
  0x24   : > { %s483_s14 = scalar_lea.vmem %s111_s25, 64  ;;  %p491_p11 = scmp.lt.s32.totalorder %s111_s25, %s111_s25 }
  0x25   : > { %p484_p0 = scmp.ne.s32.totalorder %s111_s25, %s483_s14  ;;  %p492_p6 = scmp.lt.s32.totalorder %s483_s14, %s483_s14 }
  0x27   : > { %p486_p1 = pnand %p484_p0, %p472_p9  ;;  %p493_p13 = por %p492_p6, %p491_p11 }
  0x29   : > { %p487_p12 = pneg %p486_p1 }
  0x2b   : > { %p494_p3 = pnand %p493_p13, %p487_p12 }
  0x2d   : > { %497 = shalt.err (!%p494_p3)
}
  0x2e   : > { %413 = dma.hbm_to_vmem [thread:$0]  (!%p691_p7), %s818_s0, 64, %s111_s25, [#allocation3]  }
  0x2f   : > { %s399_s19 = sshll.u32 %s598_s12, 9  ;;  %s125_s24 = scalar_lea.vmem [#allocation5], %s381_s29 }
  0x30   : > { %s132_s30 = sshll.u32 %s125_s24, 4  ;;  %s722_s5 = scalar_lea.hbm %s819_s1, %s399_s19  ;;  %s724_s30 = int_to_ptr.vmem [resolvable:$true] %s132_s30 }
  0x31   : > { %s726_s26 = scalar_lea.sflag [#allocation6], %s121_s27  ;;  %s498_s6 = scalar_lea.hbm %s722_s5, 512 }
  0x32   : > { %p499_p6 = scmp.ne.s32.totalorder %s722_s5, %s498_s6  ;;  %p834_p11 = scmp.ne.s32.totalorder %s833_s28, 0 }
  0x33   : > { %s503_s7 = scalar_lea.hbm %s819_s1, 1024  ;;  %p504_p7 = scmp.lt.u32.totalorder %s722_s5, %s819_s1 }
  0x34   : > { %p500_p12 = pneg %p834_p11  ;;  %p505_p3 = scmp.lt.u32.totalorder %s503_s7, %s498_s6 }
  0x35   : > { %p507_p9 = scmp.lt.u32.totalorder %s498_s6, %s722_s5 }
  0x36   : > { %p501_p13 = pnand %p500_p12, %p499_p6  ;;  %p506_p8 = por %p505_p3, %p504_p7 }
  0x38   : > { %p502_p1 = pneg %p501_p13  ;;  %p508_p10 = por %p507_p9, %p506_p8 }
  0x3a   : > { %p509_p2 = pnand %p508_p10, %p502_p1 }
  0x3c   : > { %512 = shalt.err (!%p509_p2)
}
  0x3d   : > { %s513_s27 = scalar_lea.vmem %s724_s30, 512  ;;  %s601_s16 = smov [#allocation5]  }
  0x3e   : > { %p514_p4 = scmp.ne.s32.totalorder %s724_s30, %s513_s27  ;;  %s518_s17 = sshll.u32 %s601_s16, 4  ;;  %s519_s17 = int_to_ptr.vmem [resolvable:$false] %s518_s17 }
  0x3f   : > { %s520_s19 = scalar_lea.vmem %s519_s17, 1024  ;;  %p521_p6 = scmp.lt.s32.totalorder %s724_s30, %s519_s17 }
  0x40   : > { %p516_p5 = pnand %p514_p4, %p500_p12  ;;  %p522_p13 = scmp.lt.s32.totalorder %s520_s19, %s513_s27 }
  0x42   : > { %p517_p0 = pneg %p516_p5  ;;  %p523_p7 = por %p522_p13, %p521_p6 }
  0x44   : > { %p524_p3 = pnand %p523_p7, %p517_p0 }
  0x46   : > { %527 = shalt.err (!%p524_p3)
}
  0x47   : > { %s602_s24 = smov 128   ;;  %s603_s3 = smov 8  }
  0x48   : > { %417 = dma.hbm_to_vmem [thread:$0]  (!%p834_p11), %s722_s5, 512, %s724_s30, %s726_s26, %s602_s24, %s602_s24, %s603_s3  }
  0x49   : > { %p835_p12 = scmp.ne.s32.totalorder %s830_s23, 0 }
  0x4a   : > { %p836_p1 = scmp.eq.s32.totalorder (!%p835_p12), %s642_s13, 0 }
  0x4b   : > { %144 = sbr.rel (%p835_p12) target bundleno = 497 (0x1f1), region = 28 }
  0x52   : > { %573 = dma.done.wait (%p836_p1), [#allocation3], 64   ;;  %p837_p8 = pmov %p836_p1 }
  0x53   : > { %s761_s4 = sand.u32 1, %s590_s10   ;;  %p838_p9 = scmp.ne.s32.totalorder %s827_s20, 0 }
  0x54   : > { %575 = vsyncadd (%p837_p8), [#allocation3], 4294967232  ;;  %s386_s6 = sshll.u32 %s761_s4, 5  ;;  %s151_s25 = scalar_lea.sflag [#allocation6], %s761_s4 }
  0x55   : > { %s154_s29 = scalar_lea.vmem [#allocation5], %s386_s6 }
  0x56   : > { %577 = dma.done.wait (%p838_p9), %s151_s25, 512  }
  0x57   : > { %579 = vsyncadd (%p838_p9), %s151_s25, 4294966784  ;;  %v604_v0 = vmov 0   ;;  %v462_v1 = vld [vmem:[%s154_s29 + $0x4] ss:$8 sps:$4 sm:$0xff]   ;;  %v464_v2 = vld [vmem:[%s154_s29] ss:$8 sps:$4 sm:$0xff]  }
  0x58   : > { %237 = vmatprep.mubr.bf16.mxu0 %v604_v0  ;;  %205 = vmatprep.subr.bf16.mxu0 %v462_v1  ;;  %v465_v3 = vld [vmem:[%s154_s29 + $0x14] ss:$8 sps:$4 sm:$0xff]   ;;  %v467_v4 = vld [vmem:[%s154_s29 + $0x10] ss:$8 sps:$4 sm:$0xff]   ;;  %vm201_vm0 = vcmask 261120   ;;  %s387_s20 = sshll.u32 %s761_s4, 3 }
  0x59   : > { %206 = vmatpush1.bf16.msra.mxu0 %v464_v2  ;;  %v176_v5 = vld [vmem:[#allocation2] sm:$0xf]  ;;  %s401_s23 = sshll.u32 %s642_s13, 7  ;;  %s174_s28 = scalar_lea.vmem [#allocation7], %s387_s20 }
  0x5a   : > { %207 = vmatprep.subr.bf16.mxu0 %v465_v3  ;;  %s295_s30 = sshll.u32 %s174_s28, 4  ;;  %s774_s7 = scalar_lea.hbm %s820_s2, %s401_s23  ;;  %s776_s30 = int_to_ptr.vmem [resolvable:$true] %s295_s30 }
  0x5b   : > { %s281_s13 = scalar_lea.sflag [#allocation4], %s761_s4  ;;  %s528_s8 = scalar_lea.vmem %s776_s30, 128 }
  0x5c   : > { %p529_p11 = scmp.ne.s32.totalorder %s776_s30, %s528_s8  ;;  %p839_p10 = scmp.ne.s32.totalorder %s828_s21, 0 }
  0x5d   : > { %208 = vmatpush1.bf16.msra.mxu0 %v467_v4  ;;  %s605_s14 = smov [#allocation7]  }
  0x5e   : > { %p530_p2 = pnand %p529_p11, %p839_p10  ;;  %s532_s27 = sshll.u32 %s605_s14, 4  ;;  %s533_s27 = int_to_ptr.vmem [resolvable:$false] %s532_s27 }
  0x5f   : > { %s534_s16 = scalar_lea.vmem %s533_s27, 256  ;;  %p535_p5 = scmp.lt.s32.totalorder %s776_s30, %s533_s27 }
  0x60   : > { %392 = vmatmul.mubr.msk.bf16.vlgmr.msra.gmra.mrb[0].mxu0 %vm201_vm0, %v176_v5  ;;  %p531_p4 = pneg %p530_p2  ;;  %p536_p0 = scmp.lt.s32.totalorder %s534_s16, %s528_s8 }
  0x62   : > { %p537_p6 = por %p536_p0, %p535_p5 }
  0x64   : > { %p538_p13 = pnand %p537_p6, %p531_p4 }
 0x133   : > { %v239_v6 = vpop.f32.mrb[0].mxu0 }
 0x134   : > { %v241_v7 = vpop.f32.mrb[1].mxu0  ;;  %v249_v8 = vmul.f32 %v239_v6, %v239_v6 }
 0x135   : > { %v243_v9 = vpop.f32.mrb[2].mxu0  ;;  %v246_v10 = vadd.f32 %v241_v7, %v239_v6  ;;  %v250_v11 = vmul.f32 %v241_v7, %v241_v7 }
 0x136   : > { %v244_v12 = vpop.f32.mrb[3].mxu0 }
 0x137   : > { %247 = vadd.xlane.f32.xlu0 %v246_v10  ;;  %v251_v13 = vadd.f32 %v250_v11, %v249_v8 }
 0x13b   : > { %252 = vadd.xlane.f32.xlu0 %v251_v13 }
 0x1c4   : > { %v248_v14 = vpop.xlane.xlu0 %247 }
 0x1c5   : > { %v254_v15 = vmul.f32 0.00390625, %v248_v14 }
 0x1c7   : > { %v256_v17 = vmul.f32 %v254_v15, %v254_v15  ;;  %v259_v22 = vsub.f32 %v239_v6, %v254_v15  ;;  %v260_v23 = vsub.f32 %v241_v7, %v254_v15 }
 0x1c8   : > { %v253_v16 = vpop.xlane.xlu0 %252 }
 0x1c9   : > { %v255_v18 = vmul.f32 0.00390625, %v253_v16 }
 0x1cb   : > { %v257_v19 = vsub.f32 %v255_v18, %v256_v17 }
 0x1cd   : > { %v258_v20 = vmax.f32 %v257_v19, 0.0 }
 0x1cf   : > { %v261_v21 = vadd.f32 1e-05, %v258_v20 }
 0x1d1   : > { %468 = vrsqrt.f32 %v261_v21 }
 0x1db   : > { %v469_v24 = vpop.eup %468 }
 0x1dc   : > { %v263_v25 = vmul.f32 %v469_v24, %v259_v22  ;;  %v264_v26 = vmul.f32 %v469_v24, %v260_v23 }
 0x1de   : > { %vm265_vm1 = vcmp.ge.f32.partialorder %v263_v25, 0.0  ;;  %vm266_vm2 = vcmp.ge.f32.partialorder %v264_v26, 0.0  ;;  %v267_v27 = vmul.f32 0.01, %v263_v25  ;;  %v268_v28 = vmul.f32 0.01, %v264_v26 }
 0x1e0   : > { %v269_v29 = vsel %vm265_vm1, %v263_v25, %v267_v27  ;;  %v270_v30 = vsel %vm266_vm2, %v264_v26, %v268_v28 }
 0x1e1   : > { %v400_v31 = vpack.c.bf16 %v270_v30, %v269_v29 }
 0x1e3   : > { %279 = vst [vmem:[%s174_s28] sm:$0xff] %v400_v31 }
 0x1e4   : > { %541 = shalt.err (!%p538_p13)
}
 0x1e5   : > { %s542_s17 = scalar_lea.hbm %s774_s7, 128  ;;  %s546_s3 = scalar_lea.hbm %s820_s2, 256 }
 0x1e6   : > { %p543_p7 = scmp.ne.s32.totalorder %s774_s7, %s542_s17  ;;  %p547_p1 = scmp.lt.u32.totalorder %s774_s7, %s820_s2 }
 0x1e7   : > { %p548_p8 = scmp.lt.u32.totalorder %s546_s3, %s542_s17  ;;  %p550_p11 = scmp.lt.u32.totalorder %s542_s17, %s774_s7 }
 0x1e8   : > { %p544_p3 = pnand %p543_p7, %p839_p10 }
 0x1e9   : > { %p549_p9 = por %p548_p8, %p547_p1 }
 0x1ea   : > { %p545_p12 = pneg %p544_p3 }
 0x1eb   : > { %p551_p2 = por %p550_p11, %p549_p9 }
 0x1ed   : > { %p552_p4 = pnand %p551_p2, %p545_p12 }
 0x1ef   : > { %555 = shalt.err (!%p552_p4)
}
 0x1f0   : > { %408 = dma.vmem_to_hbm [thread:$0]  (%p839_p10), %s776_s30, 128, %s774_s7, %s281_s13  }
 0x1f1 PF: > { %s307_s25 = sand.u32 1, %s586_s9   ;;  %p840_p5 = scmp.ne.s32.totalorder %s829_s22, 0 }
 0x1f2   : > { %p841_p0 = scmp.ge.s32.totalorder %s598_s12, 2  ;;  %s308_s29 = scalar_lea.sflag [#allocation4], %s307_s25 }
 0x1f4   : > { %p419_p6 = pnand %p841_p0, %p840_p5 }
 0x1f6   : > { %581 = dma.done.wait (!%p419_p6), %s308_s29, 128  }
 0x1f7   : > { %583 = vsyncadd (!%p419_p6), %s308_s29, 4294967168  ;;  %p16_p13 = scmp.ge.s32.totalorder %s646_s15, 4   ;;  %s842_s9 = smov %s590_s10 }
 0x1f8   : > { %s843_s10 = smov %s594_s11  ;;  %s844_s11 = smov %s658_s18 }
 0x1f9   : > { %s845_s12 = smov %s646_s15  ;;  %18 = sbr.rel (!%p16_p13) target bundleno = 6 (0x6), region = 78 }
 0x200   :  { %313 = vsyncpa [#allocation3], 1 }
 0x201   :  { %315 = vsyncpa [#allocation3 + $0x1], 1 }
 0x202   :  { %316 = vsyncpa [#allocation6], 1 }
 0x203   :  { %318 = vsyncpa [#allocation6 + $0x1], 1 }
 0x204   :  { %319 = vsyncpa [#allocation4], 1 }
 0x205   :  { %321 = vsyncpa [#allocation4 + $0x1], 1 }

</bundles_post_ra>
